<compile_context>
chip_gen: v7x
topology: tpu7x:2x2x1
jax: 0.10.0
libtpu: 0.0.40
codegen_flags: <defaults>
</compile_context>

<pallas_src>
import functools

import jax
import jax.numpy as jnp
import numpy as np
from jax.experimental import pallas as pl
from jax.experimental.pallas import tpu as pltpu

BASIS_SIZE = 33


# ------------------------------------------------------------------ glue: Legendre basis
def legendre_basis(t, basis_size=BASIS_SIZE, start=0.0, end=1.0):
    """Legendre basis of a scalar t -> (basis_size,) float32 (matches Legendre._forward)."""
    scale = 2.0 / (end - start)
    offset = -(start + end) / (end - start)
    s = scale * t + offset
    vals = [jnp.ones_like(s)]
    if basis_size > 1:
        vals.append(s)
        for i in range(1, basis_size - 1):
            vals.append(((2 * i + 1) * s * vals[i] - i * vals[i - 1]) / (i + 1))
    arange = jnp.sqrt(jnp.arange(1, 2 * basis_size, 2, dtype=jnp.float32))
    return arange * jnp.stack(vals, axis=-1)


# ------------------------------------------------------------------ VMEM budgeting
_MIN_BLOCK_BYTES = 4 * 1024 * 1024  # keep per-step blocks big: ~0.35us fixed overhead/step


def _vmem_params():
    """(block budget bytes, vmem_limit_bytes) sized per TPU generation."""
    cap = None
    try:
        cap = int(pltpu.get_tpu_info().vmem_capacity_bytes)
    except Exception:
        cap = None
    if cap is None:
        cap = 64 * 1024 * 1024  # conservative: v7x per-TensorCore physical VMEM
    if cap >= 96 * 1024 * 1024:          # v5e / v6e class: 128 MiB physical per TensorCore
        limit = 96 * 1024 * 1024
    else:                                 # v7x class: 64 MiB physical per TensorCore
        limit = 48 * 1024 * 1024
    budget = limit // 2                   # what the tile pickers may spend on blocks + temps
    return budget, limit


def _sublane_multiple(itemsize):
    # Sub-32-bit dtypes pack along sublanes: bf16 needs 16-row tiles, int8/fp8 need 32.
    return {4: 8, 2: 16, 1: 32}.get(itemsize, 8)


def _pick_c_tile_fused(N, C, HW, in_itemsize, out_itemsize, budget):
    """Channel tile for the fused single-pass kernel, or None if no tile fits the budget."""
    sublane = _sublane_multiple(in_itemsize)
    # Per channel of block: double-buffered in/out blocks + in-kernel f32 temporaries
    # (the float32 upcast of x and the x*x transient feeding the sum-of-squares).
    per_c = N * HW * (2 * in_itemsize + 2 * out_itemsize + 2 * 4)
    max_c = int(budget // max(per_c, 1))
    cands = [t for t in range(1, C + 1)
             if C % t == 0 and (t % sublane == 0 or t == C) and t <= max_c]
    if not cands:
        return None
    biggest = max(cands)

    def block_bytes(t):
        return t * N * HW * in_itemsize

    # Prefer >= 2 grid programs so ("parallel",) shards channels across both v7x
    # TensorCores, but never shrink a block below ~4 MiB just to get more steps.
    multi = [t for t in cands if C // t >= 2]
    if multi:
        pick = max(multi)
        if block_bytes(pick) >= _MIN_BLOCK_BYTES or block_bytes(biggest) < 2 * _MIN_BLOCK_BYTES:
            return pick
    return biggest


def _pick_fallback_tiles(N, C, HW, in_itemsize, out_itemsize, budget):
    """(c_tile, hw_tile) for the two-pass (stats accumulation + normalize) path."""
    sublane = _sublane_multiple(in_itemsize)
    c_tile = C
    for t in range(sublane, C, sublane):
        if C % t == 0:
            c_tile = t
            break
    # Per HW column of block: triple-buffered stats input + double-buffered normalize
    # in/out + in-kernel f32 temporaries.
    per_col = N * c_tile * (3 * in_itemsize + 2 * out_itemsize + 2 * 4)
    max_hw = max(int(budget // max(per_col, 1)), 1)
    if max_hw >= HW:
        return c_tile, HW
    # Prefer an exact divisor of HW that is a multiple of 128 (no tail masking / partial blocks).
    hw_tile = 0
    for t in range(128, max_hw + 1, 128):
        if HW % t == 0:
            hw_tile = t
    if hw_tile == 0:
        hw_tile = max(128 * (max_hw // 128), 128)
    return c_tile, hw_tile


# ------------------------------------------------------------------ Pallas kernels
def _bn_fused_kernel(x_ref, w_ref, b_ref, o_ref, *, inv_m, inv_m1):
    """Single pass over the whole (N, c_tile, HW) channel slab.

    Stats reduce axis 0 first (VPU vreg adds), then the lane axis 2 (one XLU reduce
    per channel).  No (x - mean) temporary:
        var = (sum(x^2) - sum(x)*mean) * 1/(M-1), clamped at 0.2
        out = x * (inv_std * w) + (b - mean * inv_std * w)
    """
    x = x_ref[...].astype(jnp.float32)                                     # (N, c, HW)
    s = jnp.sum(jnp.sum(x, axis=0, keepdims=True), axis=2, keepdims=True)  # (1, c, 1)
    ssq = jnp.sum(jnp.sum(x * x, axis=0, keepdims=True), axis=2, keepdims=True)
    mean = s * inv_m
    var = jnp.maximum((ssq - s * mean) * inv_m1, jnp.float32(0.2))
    inv_std = jax.lax.rsqrt(var)                # EUP, == exp(-0.5*log(var)) of the module
    scale = inv_std * w_ref[...].astype(jnp.float32)                       # (1, c, 1)
    shift = b_ref[...].astype(jnp.float32) - mean * scale                  # (1, c, 1)
    o_ref[...] = (x * scale + shift).astype(o_ref.dtype)


def _bn_stats_kernel(x_ref, w_ref, b_ref, scale_ref, shift_ref, sum_ref, ssq_ref,
                     *, hw, hw_tile, inv_m, inv_m1, needs_mask):
    """HW-tiled stats accumulation; finalizes per-channel (scale, shift) at the last tile."""
    m = pl.program_id(1)

    @pl.when(m == 0)
    def _():
        sum_ref[...] = jnp.zeros_like(sum_ref)
        ssq_ref[...] = jnp.zeros_like(ssq_ref)

    x = x_ref[...].astype(jnp.float32)                                     # (N, c, hw_t)
    if needs_mask:  # tail block: zero out-of-range lanes so they don't pollute the stats
        col = jax.lax.broadcasted_iota(jnp.int32, x.shape, 2)
        x = jnp.where(col < (hw - m * hw_tile), x, jnp.float32(0.0))
    sum_ref[...] += jnp.sum(jnp.sum(x, axis=0, keepdims=True), axis=2, keepdims=True)
    ssq_ref[...] += jnp.sum(jnp.sum(x * x, axis=0, keepdims=True), axis=2, keepdims=True)

    @pl.when(m == pl.num_programs(1) - 1)
    def _():
        s = sum_ref[...]
        mean = s * inv_m
        var = jnp.maximum((ssq_ref[...] - s * mean) * inv_m1, jnp.float32(0.2))
        inv_std = jax.lax.rsqrt(var)
        scale = inv_std * w_ref[...].astype(jnp.float32)
        scale_ref[...] = scale
        shift_ref[...] = b_ref[...].astype(jnp.float32) - mean * scale


def _bn_norm_kernel(x_ref, scale_ref, shift_ref, o_ref):
    """Elementwise normalize sweep: out = x*scale + shift."""
    x = x_ref[...].astype(jnp.float32)
    o_ref[...] = (x * scale_ref[...] + shift_ref[...]).astype(o_ref.dtype)


def _buffered_block_spec(block_shape, index_map, nbuf):
    try:
        return pl.BlockSpec(block_shape, index_map, pipeline_mode=pl.Buffered(nbuf))
    except Exception:  # older jax without pipeline_mode / pl.Buffered
        return pl.BlockSpec(block_shape, index_map)


# ------------------------------------------------------------------ wrapper
def batchnorm_pallas(t, x, affine_weight, affine_bias, *, vmem_budget_bytes=None):
    """t: scalar; x: (N, C, H, W); affine_weight/affine_bias: (1, C, 1, 1, BASIS_SIZE)."""
    N, C, H, W = x.shape
    HW = H * W
    M = N * HW
    in_itemsize = jnp.dtype(x.dtype).itemsize
    out_itemsize = in_itemsize

    # --- glue (tiny, plain JAX): time-dependent per-channel affine from the Legendre basis
    basis = legendre_basis(jnp.asarray(t, jnp.float32))                           # (33,)
    w_c = jnp.einsum("abcdk,k->abcd", affine_weight, basis).reshape(1, C, 1)
    b_c = jnp.einsum("abcdk,k->abcd", affine_bias, basis).reshape(1, C, 1)

    # --- free reshape (no HBM transpose): NCHW -> (N, C, HW)
    # TODO(synk): if HW % 128 != 0 (e.g. 7x7 / 14x14 feature maps) the output stores are
    # masked vst.msk; pad HW to a multiple of 128 upstream for lane-dense writeback.
    x3 = x.reshape(N, C, HW)

    budget, vmem_limit = _vmem_params()
    if vmem_budget_bytes is not None:  # manual override / test hook
        budget = vmem_budget_bytes
    inv_m = 1.0 / M
    inv_m1 = 1.0 / max(M - 1, 1)

    c_tile = _pick_c_tile_fused(N, C, HW, in_itemsize, out_itemsize, budget)

    if c_tile is not None:
        # ---------- fused single pass: 1 HBM read + 1 HBM write ----------
        kernel = functools.partial(_bn_fused_kernel, inv_m=inv_m, inv_m1=inv_m1)
        cost = pl.CostEstimate(
            flops=7 * N * C * HW, transcendentals=C,
            bytes_accessed=N * C * HW * (in_itemsize + out_itemsize) + 2 * C * 4)
        out3 = pl.pallas_call(
            kernel,
            out_shape=jax.ShapeDtypeStruct((N, C, HW), x.dtype),
            grid=(C // c_tile,),
            in_specs=[
                pl.BlockSpec((N, c_tile, HW), lambda c: (0, c, 0)),
                pl.BlockSpec((1, c_tile, 1), lambda c: (0, c, 0)),
                pl.BlockSpec((1, c_tile, 1), lambda c: (0, c, 0)),
            ],
            out_specs=pl.BlockSpec((N, c_tile, HW), lambda c: (0, c, 0)),
            compiler_params=pltpu.CompilerParams(
                dimension_semantics=("parallel",), vmem_limit_bytes=vmem_limit),
            cost_estimate=cost,
        )(x3, w_c, b_c)
        return out3.reshape(N, C, H, W)

    # ---------- two-pass fallback: HW-tiled stats accumulation + normalize sweep ----------
    c_tile, hw_tile = _pick_fallback_tiles(N, C, HW, in_itemsize, out_itemsize, budget)
    n_c = C // c_tile
    n_m = pl.cdiv(HW, hw_tile)
    needs_mask = (HW % hw_tile) != 0

    stats_kernel = functools.partial(
        _bn_stats_kernel, hw=HW, hw_tile=hw_tile, inv_m=inv_m, inv_m1=inv_m1,
        needs_mask=needs_mask)
    stats_cost = pl.CostEstimate(
        flops=5 * N * C * HW, transcendentals=C,
        bytes_accessed=N * C * HW * in_itemsize + 4 * C * 4)
    scale_c, shift_c = pl.pallas_call(
        stats_kernel,
        out_shape=(jax.ShapeDtypeStruct((1, C, 1), jnp.float32),
                   jax.ShapeDtypeStruct((1, C, 1), jnp.float32)),
        grid=(n_c, n_m),
        in_specs=[
            _buffered_block_spec((N, c_tile, hw_tile), lambda c, m: (0, c, m), 3),
            pl.BlockSpec((1, c_tile, 1), lambda c, m: (0, c, 0)),
            pl.BlockSpec((1, c_tile, 1), lambda c, m: (0, c, 0)),
        ],
        out_specs=(pl.BlockSpec((1, c_tile, 1), lambda c, m: (0, c, 0)),
                   pl.BlockSpec((1, c_tile, 1), lambda c, m: (0, c, 0))),
        scratch_shapes=[pltpu.VMEM((1, c_tile, 1), jnp.float32),
                        pltpu.VMEM((1, c_tile, 1), jnp.float32)],
        compiler_params=pltpu.CompilerParams(
            dimension_semantics=("parallel", "arbitrary"), vmem_limit_bytes=vmem_limit),
        cost_estimate=stats_cost,
    )(x3, w_c, b_c)

    norm_cost = pl.CostEstimate(
        flops=2 * N * C * HW, transcendentals=0,
        bytes_accessed=N * C * HW * (in_itemsize + out_itemsize) + 2 * C * 4)
    out3 = pl.pallas_call(
        _bn_norm_kernel,
        out_shape=jax.ShapeDtypeStruct((N, C, HW), x.dtype),
        grid=(n_c, n_m),
        in_specs=[
            _buffered_block_spec((N, c_tile, hw_tile), lambda c, m: (0, c, m), 3),
            pl.BlockSpec((1, c_tile, 1), lambda c, m: (0, c, 0)),
            pl.BlockSpec((1, c_tile, 1), lambda c, m: (0, c, 0)),
        ],
        out_specs=pl.BlockSpec((N, c_tile, hw_tile), lambda c, m: (0, c, m)),
        compiler_params=pltpu.CompilerParams(
            dimension_semantics=("parallel", "parallel"), vmem_limit_bytes=vmem_limit),
        cost_estimate=norm_cost,
    )(x3, scale_c, shift_c)
    return out3.reshape(N, C, H, W)


# ------------------------------------------------------------------ pure-JAX reference
def batchnorm_ref(t, x, affine_weight, affine_bias):
    N, C, H, W = x.shape
    x_t = jnp.transpose(x, (1, 0, 2, 3)).reshape(C, -1)
    mean = jnp.mean(x_t, axis=1)
    var = jnp.var(x_t, axis=1, ddof=1)
    var = jnp.maximum(var, 0.2)
    bias = (-mean).reshape(1, C, 1, 1)
    weight = (-0.5 * jnp.log(var)).reshape(1, C, 1, 1)
    y = (x + bias) * jnp.exp(weight)
    basis = legendre_basis(jnp.asarray(t, jnp.float32))
    w = jnp.einsum("abcdk,k->abcd", affine_weight, basis)
    b = jnp.einsum("abcdk,k->abcd", affine_bias, basis)
    return y * w + b


if __name__ == "__main__":
    N, C, H, W = 2, 4, 16, 16
    key = jax.random.PRNGKey(0)
    x = jax.random.normal(key, (N, C, H, W), dtype=jnp.float32) * 2.0 + 0.5
    t = jnp.float32(0.37)

    # ContinuousAffine parameter init (matches reset_parameters): weight[...,0]=1, rest 0; bias=0.
    affine_weight = jnp.zeros((1, C, 1, 1, BASIS_SIZE), jnp.float32).at[..., 0].set(1.0)
    affine_bias = jnp.zeros((1, C, 1, 1, BASIS_SIZE), jnp.float32)

    ref = jax.block_until_ready(batchnorm_ref(t, x, affine_weight, affine_bias))

    # Fused single-pass path (normal budget).
    out = jax.block_until_ready(batchnorm_pallas(t, x, affine_weight, affine_bias))
    np.testing.assert_allclose(np.asarray(out), np.asarray(ref), rtol=1e-5, atol=1e-5)

    # Two-pass (HW-tiled stats + normalize) fallback path, forced via a tiny VMEM budget.
    out_fb = jax.block_until_ready(
        batchnorm_pallas(t, x, affine_weight, affine_bias, vmem_budget_bytes=16 * 1024))
    np.testing.assert_allclose(np.asarray(out_fb), np.asarray(ref), rtol=1e-5, atol=1e-5)

    print("KERNEL_OK")
</pallas_src>

<mosaic_0001>
module attributes {stable_mosaic.version = 11 : i64} {
  func.func @_bn_fused_kernel(%arg0: i32, %arg1: memref<2x4x256xf32, #tpu.memory_space<vmem>>, %arg2: memref<1x4x1xf32, #tpu.memory_space<vmem>>, %arg3: memref<1x4x1xf32, #tpu.memory_space<vmem>>, %arg4: memref<2x4x256xf32, #tpu.memory_space<vmem>>) attributes {dimension_semantics = [#tpu.dimension_semantics<parallel>], iteration_bounds = array<i64: 1>, scalar_prefetch = 0 : i64, scratch_operands = 0 : i64, tpu.core_type = #tpu.core_type<tc>, window_params = [{transform_indices = @transform_0, window_bounds = array<i64: 2, 4, 256>}, {transform_indices = @transform_1, window_bounds = array<i64: 1, 4, 1>}, {transform_indices = @transform_2, window_bounds = array<i64: 1, 4, 1>}, {transform_indices = @transform_3, window_bounds = array<i64: 2, 4, 256>}]} {
    %c0 = arith.constant 0 : index
    %c0_0 = arith.constant 0 : index
    %c0_1 = arith.constant 0 : index
    %0 = vector.load %arg1[%c0, %c0_0, %c0_1] : memref<2x4x256xf32, #tpu.memory_space<vmem>>, vector<2x4x256xf32>
    %cst = arith.constant dense<0.000000e+00> : vector<4x256xf32>
    %1 = vector.multi_reduction <add>, %0, %cst [0] : vector<2x4x256xf32> to vector<4x256xf32>
    %2 = vector.shape_cast %1 : vector<4x256xf32> to vector<1x4x256xf32>
    %cst_2 = arith.constant dense<0.000000e+00> : vector<1x4xf32>
    %3 = vector.multi_reduction <add>, %2, %cst_2 [2] : vector<1x4x256xf32> to vector<1x4xf32>
    %4 = vector.shape_cast %3 : vector<1x4xf32> to vector<1x4x1xf32>
    %5 = arith.mulf %0, %0 : vector<2x4x256xf32>
    %cst_3 = arith.constant dense<0.000000e+00> : vector<4x256xf32>
    %6 = vector.multi_reduction <add>, %5, %cst_3 [0] : vector<2x4x256xf32> to vector<4x256xf32>
    %7 = vector.shape_cast %6 : vector<4x256xf32> to vector<1x4x256xf32>
    %cst_4 = arith.constant dense<0.000000e+00> : vector<1x4xf32>
    %8 = vector.multi_reduction <add>, %7, %cst_4 [2] : vector<1x4x256xf32> to vector<1x4xf32>
    %9 = vector.shape_cast %8 : vector<1x4xf32> to vector<1x4x1xf32>
    %cst_5 = arith.constant 0.001953125 : f32
    %10 = vector.broadcast %cst_5 : f32 to vector<1x4x1xf32>
    %11 = arith.mulf %4, %10 : vector<1x4x1xf32>
    %12 = arith.mulf %4, %11 : vector<1x4x1xf32>
    %13 = arith.subf %9, %12 : vector<1x4x1xf32>
    %cst_6 = arith.constant 0.00195694715 : f32
    %14 = vector.broadcast %cst_6 : f32 to vector<1x4x1xf32>
    %15 = arith.mulf %13, %14 : vector<1x4x1xf32>
    %cst_7 = arith.constant 2.000000e-01 : f32
    %16 = vector.broadcast %cst_7 : f32 to vector<1x4x1xf32>
    %17 = arith.maximumf %15, %16 : vector<1x4x1xf32>
    %18 = math.rsqrt %17 : vector<1x4x1xf32>
    %c0_8 = arith.constant 0 : index
    %c0_9 = arith.constant 0 : index
    %c0_10 = arith.constant 0 : index
    %19 = vector.load %arg2[%c0_8, %c0_9, %c0_10] : memref<1x4x1xf32, #tpu.memory_space<vmem>>, vector<1x4x1xf32>
    %20 = arith.mulf %18, %19 : vector<1x4x1xf32>
    %c0_11 = arith.constant 0 : index
    %c0_12 = arith.constant 0 : index
    %c0_13 = arith.constant 0 : index
    %21 = vector.load %arg3[%c0_11, %c0_12, %c0_13] : memref<1x4x1xf32, #tpu.memory_space<vmem>>, vector<1x4x1xf32>
    %22 = arith.mulf %11, %20 : vector<1x4x1xf32>
    %23 = arith.subf %21, %22 : vector<1x4x1xf32>
    %24 = vector.broadcast %20 : vector<1x4x1xf32> to vector<2x4x256xf32>
    %25 = arith.mulf %0, %24 : vector<2x4x256xf32>
    %26 = vector.broadcast %23 : vector<1x4x1xf32> to vector<2x4x256xf32>
    %27 = arith.addf %25, %26 : vector<2x4x256xf32>
    %c0_14 = arith.constant 0 : index
    %c0_15 = arith.constant 0 : index
    %c0_16 = arith.constant 0 : index
    %28 = vector.load %arg4[%c0_14, %c0_15, %c0_16] : memref<2x4x256xf32, #tpu.memory_space<vmem>>, vector<2x4x256xf32>
    tpu.vector_store %arg4[%c0_14, %c0_15, %c0_16], %27 {strides = array<i32>} : memref<2x4x256xf32, #tpu.memory_space<vmem>>, vector<2x4x256xf32>,
    return
  }
  func.func @transform_0(%arg0: i32) -> (i32, i32, i32) {
    %c0_i32 = arith.constant 0 : i32
    %c0_i32_0 = arith.constant 0 : i32
    %c0_i32_1 = arith.constant 0 : i32
    return %c0_i32, %arg0, %c0_i32_0 : i32, i32, i32
  }
  func.func @transform_1(%arg0: i32) -> (i32, i32, i32) {
    %c0_i32 = arith.constant 0 : i32
    %c0_i32_0 = arith.constant 0 : i32
    %c0_i32_1 = arith.constant 0 : i32
    return %c0_i32, %arg0, %c0_i32_0 : i32, i32, i32
  }
  func.func @transform_2(%arg0: i32) -> (i32, i32, i32) {
    %c0_i32 = arith.constant 0 : i32
    %c0_i32_0 = arith.constant 0 : i32
    %c0_i32_1 = arith.constant 0 : i32
    return %c0_i32, %arg0, %c0_i32_0 : i32, i32, i32
  }
  func.func @transform_3(%arg0: i32) -> (i32, i32, i32) {
    %c0_i32 = arith.constant 0 : i32
    %c0_i32_0 = arith.constant 0 : i32
    %c0_i32_1 = arith.constant 0 : i32
    return %c0_i32, %arg0, %c0_i32_0 : i32, i32, i32
  }
}

</mosaic_0001>

<bundles_post_ra>
// kernel: tpu_custom_call.1
= control target key start
LH: loop header
LB: loop body
LE: loop exit
PB: predicated region body
PF: predicated region fallthrough
CT: control target
= control target key end

     0   :  { %8 = vsyncpa [#allocation3], 0  ;;  %s260_s0 = inlined_call_operand.hbm [shape: f32[2,4,256], index: 0, kind: input, shape index: {}]   ;;  %s261_s1 = inlined_call_operand.vmem [shape: f32[1,4,1], index: 1, kind: input, shape index: {}]   ;;  %s262_s2 = inlined_call_operand.vmem [shape: f32[1,4,1], index: 2, kind: input, shape index: {}]   ;;  %s263_s3 = inlined_call_operand.hbm [shape: f32[2,4,256], index: 3, kind: output, shape index: {}]  }
   0x1   :  { %9 = vsyncpa [#allocation4], 0  ;;  %s186_s12 = smov [#allocation2]   ;;  %s138_s16 = scalar_lea.hbm %s260_s0, 256 }
   0x2   :  { %s15_s13 = sshll.u32 %s186_s12, 4  ;;  %p139_p0 = scmp.ne.s32.totalorder %s260_s0, %s138_s16  ;;  %s16_s13 = int_to_ptr.vmem [resolvable:$true] %s15_s13 }
   0x3   :  { %p142_p1 = scmp.lt.u32.totalorder %s138_s16, %s260_s0 }
   0x5   :  { %p144_p2 = pnand %p142_p1, %p139_p0 }
   0x7   :  { %147 = shalt.err (!%p144_p2)
}
   0x8   :  { %s148_s21 = scalar_lea.vmem %s16_s13, 256  ;;  %p153_p4 = scmp.lt.s32.totalorder %s16_s13, %s16_s13 }
   0x9   :  { %p149_p3 = scmp.ne.s32.totalorder %s16_s13, %s148_s21  ;;  %p154_p5 = scmp.lt.s32.totalorder %s148_s21, %s148_s21 }
   0xb   :  { %p155_p6 = por %p154_p5, %p153_p4 }
   0xd   :  { %p156_p7 = pnand %p155_p6, %p149_p3 }
   0xf   :  { %159 = shalt.err (!%p156_p7)
}
  0x10   :  { %s187_s22 = smov 128   ;;  %s188_s23 = smov 8  }
  0x11   :  { %21 = dma.hbm_to_vmem [thread:$0]  %s260_s0, 256, %s16_s13, [#allocation3], %s187_s22, %s187_s22, %s188_s23  }
  0x12   :  { %182 = dma.done.wait [#allocation3], 256  }
  0x13   :  { %183 = vsyncadd [#allocation3], 4294967040  ;;  %vm37_vm0 = vcmask 1043456   ;;  %v29_v0 = vld [vmem:[#allocation2] sm:$0xff]  ;;  %v30_v1 = vld [vmem:[#allocation2 + $0x8] sm:$0xff]  ;;  %v189_v26 = vmov 0   ;;  %v86_v42 = vlaneseq }
  0x14   :  { %v33_v2 = vcombine.high %v29_v0, %v29_v0  ;;  %v34_v3 = vcombine.high %v30_v1, %v30_v1  ;;  %v38_v4 = vsel %vm37_vm0, %v29_v0, 0.0  ;;  %v39_v5 = vsel %vm37_vm0, %v30_v1, 0.0  ;;  %132 = vset.pattern.permute.xlu1 %v189_v26  ;;  %133 = vset.pattern.permute.xlu0 %v189_v26  ;;  %v74_v34 = vld [vmem:[%s261_s1] sm:$0xf]  ;;  %s191_s1 = smov [#allocation5]  }
  0x15   :  { %v40_v6 = vadd.f32 %v39_v5, %v38_v4  ;;  %v49_v7 = vmul.f32 %v29_v0, %v29_v0  ;;  %v50_v8 = vmul.f32 %v30_v1, %v30_v1  ;;  %v76_v37 = vld [vmem:[%s262_s2] sm:$0xf]  ;;  %v190_v40 = vmov 839922192   ;;  %s114_s29 = sshll.u32 %s191_s1, 4  ;;  %s115_s29 = int_to_ptr.vmem [resolvable:$true] %s114_s29 }
  0x16   :  { %v41_v9 = vsel %vm37_vm0, %v33_v2, 0.0  ;;  %v42_v10 = vsel %vm37_vm0, %v34_v3, 0.0  ;;  %v84_v41 = vunpack.c.l.s4 %v190_v40  ;;  %v87_v44 = vshrl.u32 %v86_v42, 7  ;;  %s160_s2 = scalar_lea.vmem %s115_s29, 256  ;;  %p165_p9 = scmp.lt.s32.totalorder %s115_s29, %s115_s29 }
  0x17   :  { %v43_v11 = vadd.f32 %v42_v10, %v41_v9  ;;  %v44_v12 = vsel %vm37_vm0, %v40_v6, 0.0  ;;  %v53_v13 = vcombine.high %v49_v7, %v49_v7  ;;  %v54_v14 = vcombine.high %v50_v8, %v50_v8  ;;  %p161_p8 = scmp.ne.s32.totalorder %s115_s29, %s160_s2  ;;  %p166_p10 = scmp.lt.s32.totalorder %s160_s2, %s160_s2 }
  0x18   :  { %v57_v15 = vsel %vm37_vm0, %v49_v7, 0.0  ;;  %v58_v16 = vsel %vm37_vm0, %v50_v8, 0.0  ;;  %v85_v43 = vunpack.c.0.s8 %v84_v41 }
  0x19   :  { %v45_v17 = vsel %vm37_vm0, %v43_v11, 0.0  ;;  %v59_v18 = vadd.f32 %v58_v16, %v57_v15  ;;  %v60_v19 = vsel %vm37_vm0, %v53_v13, 0.0  ;;  %v61_v20 = vsel %vm37_vm0, %v54_v14, 0.0  ;;  %p167_p11 = por %p166_p10, %p165_p9 }
  0x1a   :  { %v46_v21 = vadd.f32 %v45_v17, %v44_v12  ;;  %v62_v22 = vadd.f32 %v61_v20, %v60_v19  ;;  %v88_v45 = vsub.s32 %v85_v43, %v87_v44 }
  0x1b   :  { %v63_v23 = vsel %vm37_vm0, %v59_v18, 0.0  ;;  %p168_p12 = pnand %p167_p11, %p161_p8 }
  0x1c   :  { %47 = vadd.xlane.f32.xlu0 %v46_v21  ;;  %v64_v24 = vsel %vm37_vm0, %v62_v22, 0.0 }
  0x1d   :  { %v65_v25 = vadd.f32 %v64_v24, %v63_v23 }
  0x20   :  { %66 = vadd.xlane.f32.xlu0 %v65_v25 }
  0xa9   :  { %v48_v27 = vpop.xlane.xlu0 %47 }
  0xaa   :  { %v68_v28 = vmul.f32 0.001953125, %v48_v27 }
  0xac   :  { %v69_v29 = vmul.f32 %v68_v28, %v48_v27 }
  0xad   :  { %v67_v30 = vpop.xlane.xlu0 %66 }
  0xae   :  { %v70_v31 = vsub.f32 %v67_v30, %v69_v29 }
  0xb0   :  { %v71_v32 = vmul.f32 0.0019569471, %v70_v31 }
  0xb2   :  { %v72_v33 = vmax.f32 %v71_v32, 0.2 }
  0xb4   :  { %136 = vrsqrt.f32 %v72_v33 }
  0xbe   :  { %v137_v35 = vpop.eup %136 }
  0xbf   :  { %v75_v36 = vmul.f32 %v137_v35, %v74_v34 }
  0xc1   :  { %81 = vperm.xlu1 %132, %v75_v36   ;;  %v77_v38 = vmul.f32 %v75_v36, %v68_v28 }
  0xc3   :  { %v78_v39 = vsub.f32 %v76_v37, %v77_v38 }
  0xc5   :  { %95 = vperm.xlu1 %132, %v78_v39  }
 0x140   :  { %v82_v46 = vpop.permute.xlu1 %81 }
 0x141   :  { %v89_v47 = vrot.slane %v82_v46, %v88_v45 }
 0x143   :  { %v91_v49 = vmul.f32 %v89_v47, %v29_v0  ;;  %v92_v50 = vmul.f32 %v89_v47, %v30_v1 }
 0x144   :  { %v96_v48 = vpop.permute.xlu1 %95 }
 0x145   :  { %v103_v51 = vrot.slane %v96_v48, %v88_v45 }
 0x147   :  { %v105_v52 = vadd.f32 %v103_v51, %v91_v49  ;;  %v106_v53 = vadd.f32 %v103_v51, %v92_v50 }
 0x149   :  { %107 = vst [vmem:[#allocation5] sm:$0xff] %v105_v52  ;;  %108 = vst [vmem:[#allocation5 + $0x8] sm:$0xff] %v106_v53 }
 0x14a   :  { %171 = shalt.err (!%p168_p12)
}
 0x14b   :  { %s172_s5 = scalar_lea.hbm %s263_s3, 256 }
 0x14c   :  { %p173_p13 = scmp.ne.s32.totalorder %s263_s3, %s172_s5  ;;  %p176_p0 = scmp.lt.u32.totalorder %s172_s5, %s263_s3 }
 0x14e   :  { %p178_p1 = pnand %p176_p0, %p173_p13 }
 0x150   :  { %181 = shalt.err (!%p178_p1)
}
 0x151   :  { %120 = dma.vmem_to_hbm [thread:$0]  %s115_s29, 256, %s263_s3, [#allocation4], %s187_s22, %s187_s22, %s188_s23  }
 0x152   :  { %184 = dma.done.wait [#allocation4], 256  }
 0x153   :  { %185 = vsyncadd [#allocation4], 4294967040 }
 0x154   :  { %124 = vsyncpa [#allocation3], 1 }
 0x155   :  { %125 = vsyncpa [#allocation4], 1 }

</bundles_post_ra>
